<compile_context>
chip_gen: v7x
topology: tpu7x:2x2x1
jax: 0.10.0
libtpu: 0.0.40
codegen_flags: <defaults>
</compile_context>

<pallas_src>
import jax
import jax.numpy as jnp
from jax import lax
from jax.experimental import pallas as pl
from jax.experimental.pallas import tpu as pltpu


def _encoder_stack_kernel(x_ref, a_ref, w_ref, b_ref, o_ref):
    """One invocation; the layer loop is an unrolled in-kernel fori_loop."""
    qty = w_ref.shape[0]

    # Cast the adjacency to bf16 once (MXU operand); activation starts in f32.
    a = a_ref[...].astype(jnp.bfloat16)            # [N, N]
    x0 = x_ref[...].astype(jnp.float32)            # [N, D]

    def layer(l, x):
        w = w_ref[l]                               # [D, D] bf16 (this layer)
        b = b_ref[l]                               # [1, D] f32  (this layer)
        # Graph mix + feature transform on the MXU, bf16 in / f32 accumulate.
        h = jnp.dot(a, x.astype(jnp.bfloat16),
                    preferred_element_type=jnp.float32)          # [N, D]
        y = jnp.dot(h.astype(jnp.bfloat16), w,
                    preferred_element_type=jnp.float32)          # [N, D]
        # Bias + residual + ReLU on the VPU, kept in f32.
        return jnp.maximum(y + b + x, 0.0)

    x_out = lax.fori_loop(0, qty, layer, x0, unroll=True)

    # Single HBM writeback for the whole stack.
    o_ref[...] = x_out.astype(o_ref.dtype)


@jax.jit
def encoder_stack(x, A, W_stack, b_stack):
    """Apply all QTY encoder units in one fused, single-step pallas_call."""
    N, D = x.shape
    vmem = pltpu.MemorySpace.VMEM
    return pl.pallas_call(
        _encoder_stack_kernel,
        out_shape=jax.ShapeDtypeStruct((N, D), x.dtype),
        in_specs=[
            pl.BlockSpec(memory_space=vmem),   # x        : [N, D]  f32, fetched once
            pl.BlockSpec(memory_space=vmem),   # A        : [N, N]  f32, fetched once
            pl.BlockSpec(memory_space=vmem),   # W_stack  : [QTY, D, D] bf16, fetched once
            pl.BlockSpec(memory_space=vmem),   # b_stack  : [QTY, 1, D] f32, fetched once
        ],
        out_specs=pl.BlockSpec(memory_space=vmem),
        compiler_params=pltpu.CompilerParams(
            vmem_limit_bytes=32 * 1024 * 1024,
        ),
    )(x, A, W_stack, b_stack)


def init_params(key, depth, dim):
    """Stacked per-layer (W, b). W is stored in bf16 (MXU operand dtype) so no
    wrapper-side cast / extra HBM round-trip is needed at call time."""
    keys = jax.random.split(key, depth)
    W_stack = jax.vmap(
        lambda k: jax.random.normal(k, (dim, dim), dtype=jnp.float32)
        * (1.0 / jnp.sqrt(dim))
    )(keys).astype(jnp.bfloat16)
    scales = 0.01 * (jnp.arange(depth, dtype=jnp.float32) + 1.0)
    b_stack = scales[:, None, None] * jnp.ones((depth, 1, dim), dtype=jnp.float32)
    return W_stack, b_stack


def _reference_forward(x, A, W_stack, b_stack):
    """Pure-JAX reference with matching bf16 matmul precision."""
    for l in range(W_stack.shape[0]):
        h = jnp.dot(A.astype(jnp.bfloat16), x.astype(jnp.bfloat16),
                    preferred_element_type=jnp.float32)
        y = jnp.dot(h.astype(jnp.bfloat16), W_stack[l].astype(jnp.bfloat16),
                    preferred_element_type=jnp.float32)
        x = jnp.maximum(y + b_stack[l] + x, 0.0)
    return x


if __name__ == "__main__":
    key = jax.random.PRNGKey(0)
    k_x, k_a, k_p = jax.random.split(key, 3)

    N, D, QTY = 128, 128, 3   # nodes, hidden dim, number of stacked encoder units

    x = jax.random.normal(k_x, (N, D), dtype=jnp.float32)

    # Row-normalized random adjacency (self-loops included).
    A_raw = jax.random.uniform(k_a, (N, N), dtype=jnp.float32) + jnp.eye(N, dtype=jnp.float32)
    A = A_raw / jnp.sum(A_raw, axis=-1, keepdims=True)

    W_stack, b_stack = init_params(k_p, QTY, D)

    out = encoder_stack(x, A, W_stack, b_stack)
    out = jax.block_until_ready(out)

    assert out.shape == (N, D), out.shape
    assert jnp.all(jnp.isfinite(out))

    ref = _reference_forward(x, A, W_stack, b_stack)
    assert jnp.allclose(out, ref, rtol=5e-2, atol=1e-1), float(jnp.max(jnp.abs(out - ref)))

    print("KERNEL_OK")
</pallas_src>

<mosaic_0001>
module attributes {stable_mosaic.version = 11 : i64} {
  func.func @_encoder_stack_kernel(%arg0: memref<128x128xf32, #tpu.memory_space<vmem>>, %arg1: memref<128x128xf32, #tpu.memory_space<vmem>>, %arg2: memref<3x128x128xbf16, #tpu.memory_space<vmem>>, %arg3: memref<3x1x128xf32, #tpu.memory_space<vmem>>, %arg4: memref<128x128xf32, #tpu.memory_space<vmem>>) attributes {dimension_semantics = [], scalar_prefetch = 0 : i64, scratch_operands = 0 : i64, tpu.core_type = #tpu.core_type<tc>} {
    %c0 = arith.constant 0 : index
    %c0_0 = arith.constant 0 : index
    %0 = vector.load %arg1[%c0, %c0_0] : memref<128x128xf32, #tpu.memory_space<vmem>>, vector<128x128xf32>
    %1 = arith.truncf %0 : vector<128x128xf32> to vector<128x128xbf16>
    %c0_1 = arith.constant 0 : index
    %c0_2 = arith.constant 0 : index
    %2 = vector.load %arg0[%c0_1, %c0_2] : memref<128x128xf32, #tpu.memory_space<vmem>>, vector<128x128xf32>
    %c0_i32 = arith.constant 0 : i32
    %3 = arith.index_cast %c0_i32 : i32 to index
    %c0_3 = arith.constant 0 : index
    %c0_4 = arith.constant 0 : index
    %4 = vector.load %arg2[%3, %c0_3, %c0_4] : memref<3x128x128xbf16, #tpu.memory_space<vmem>>, vector<1x128x128xbf16>
    %5 = vector.shape_cast %4 : vector<1x128x128xbf16> to vector<128x128xbf16>
    %6 = arith.index_cast %c0_i32 : i32 to index
    %c0_5 = arith.constant 0 : index
    %c0_6 = arith.constant 0 : index
    %7 = vector.load %arg3[%6, %c0_5, %c0_6] : memref<3x1x128xf32, #tpu.memory_space<vmem>>, vector<1x1x128xf32>
    %8 = vector.shape_cast %7 : vector<1x1x128xf32> to vector<1x128xf32>
    %9 = arith.truncf %2 : vector<128x128xf32> to vector<128x128xbf16>
    %cst = arith.constant dense<0.000000e+00> : vector<128x128xf32>
    %10 = tpu.matmul %1, %9, %cst {dimension_numbers = #tpu.dot_dimension_numbers<[1], [0], [0], [1], [0, 0, 1, 1], [], []>} : vector<128x128xbf16>, vector<128x128xbf16>, vector<128x128xf32> -> vector<128x128xf32>
    %11 = arith.truncf %10 : vector<128x128xf32> to vector<128x128xbf16>
    %cst_7 = arith.constant dense<0.000000e+00> : vector<128x128xf32>
    %12 = tpu.matmul %11, %5, %cst_7 {dimension_numbers = #tpu.dot_dimension_numbers<[1], [0], [0], [1], [0, 0, 1, 1], [], []>} : vector<128x128xbf16>, vector<128x128xbf16>, vector<128x128xf32> -> vector<128x128xf32>
    %13 = vector.broadcast %8 : vector<1x128xf32> to vector<128x128xf32>
    %14 = arith.addf %12, %13 : vector<128x128xf32>
    %15 = arith.addf %14, %2 : vector<128x128xf32>
    %cst_8 = arith.constant 0.000000e+00 : f32
    %16 = vector.broadcast %cst_8 : f32 to vector<128x128xf32>
    %17 = arith.maximumf %15, %16 : vector<128x128xf32>
    %c1_i32 = arith.constant 1 : i32
    %18 = arith.index_cast %c1_i32 : i32 to index
    %c0_9 = arith.constant 0 : index
    %c0_10 = arith.constant 0 : index
    %19 = vector.load %arg2[%18, %c0_9, %c0_10] : memref<3x128x128xbf16, #tpu.memory_space<vmem>>, vector<1x128x128xbf16>
    %20 = vector.shape_cast %19 : vector<1x128x128xbf16> to vector<128x128xbf16>
    %21 = arith.index_cast %c1_i32 : i32 to index
    %c0_11 = arith.constant 0 : index
    %c0_12 = arith.constant 0 : index
    %22 = vector.load %arg3[%21, %c0_11, %c0_12] : memref<3x1x128xf32, #tpu.memory_space<vmem>>, vector<1x1x128xf32>
    %23 = vector.shape_cast %22 : vector<1x1x128xf32> to vector<1x128xf32>
    %24 = arith.truncf %17 : vector<128x128xf32> to vector<128x128xbf16>
    %cst_13 = arith.constant dense<0.000000e+00> : vector<128x128xf32>
    %25 = tpu.matmul %1, %24, %cst_13 {dimension_numbers = #tpu.dot_dimension_numbers<[1], [0], [0], [1], [0, 0, 1, 1], [], []>} : vector<128x128xbf16>, vector<128x128xbf16>, vector<128x128xf32> -> vector<128x128xf32>
    %26 = arith.truncf %25 : vector<128x128xf32> to vector<128x128xbf16>
    %cst_14 = arith.constant dense<0.000000e+00> : vector<128x128xf32>
    %27 = tpu.matmul %26, %20, %cst_14 {dimension_numbers = #tpu.dot_dimension_numbers<[1], [0], [0], [1], [0, 0, 1, 1], [], []>} : vector<128x128xbf16>, vector<128x128xbf16>, vector<128x128xf32> -> vector<128x128xf32>
    %28 = vector.broadcast %23 : vector<1x128xf32> to vector<128x128xf32>
    %29 = arith.addf %27, %28 : vector<128x128xf32>
    %30 = arith.addf %29, %17 : vector<128x128xf32>
    %cst_15 = arith.constant 0.000000e+00 : f32
    %31 = vector.broadcast %cst_15 : f32 to vector<128x128xf32>
    %32 = arith.maximumf %30, %31 : vector<128x128xf32>
    %c2_i32 = arith.constant 2 : i32
    %33 = arith.index_cast %c2_i32 : i32 to index
    %c0_16 = arith.constant 0 : index
    %c0_17 = arith.constant 0 : index
    %34 = vector.load %arg2[%33, %c0_16, %c0_17] : memref<3x128x128xbf16, #tpu.memory_space<vmem>>, vector<1x128x128xbf16>
    %35 = vector.shape_cast %34 : vector<1x128x128xbf16> to vector<128x128xbf16>
    %36 = arith.index_cast %c2_i32 : i32 to index
    %c0_18 = arith.constant 0 : index
    %c0_19 = arith.constant 0 : index
    %37 = vector.load %arg3[%36, %c0_18, %c0_19] : memref<3x1x128xf32, #tpu.memory_space<vmem>>, vector<1x1x128xf32>
    %38 = vector.shape_cast %37 : vector<1x1x128xf32> to vector<1x128xf32>
    %39 = arith.truncf %32 : vector<128x128xf32> to vector<128x128xbf16>
    %cst_20 = arith.constant dense<0.000000e+00> : vector<128x128xf32>
    %40 = tpu.matmul %1, %39, %cst_20 {dimension_numbers = #tpu.dot_dimension_numbers<[1], [0], [0], [1], [0, 0, 1, 1], [], []>} : vector<128x128xbf16>, vector<128x128xbf16>, vector<128x128xf32> -> vector<128x128xf32>
    %41 = arith.truncf %40 : vector<128x128xf32> to vector<128x128xbf16>
    %cst_21 = arith.constant dense<0.000000e+00> : vector<128x128xf32>
    %42 = tpu.matmul %41, %35, %cst_21 {dimension_numbers = #tpu.dot_dimension_numbers<[1], [0], [0], [1], [0, 0, 1, 1], [], []>} : vector<128x128xbf16>, vector<128x128xbf16>, vector<128x128xf32> -> vector<128x128xf32>
    %43 = vector.broadcast %38 : vector<1x128xf32> to vector<128x128xf32>
    %44 = arith.addf %42, %43 : vector<128x128xf32>
    %45 = arith.addf %44, %32 : vector<128x128xf32>
    %cst_22 = arith.constant 0.000000e+00 : f32
    %46 = vector.broadcast %cst_22 : f32 to vector<128x128xf32>
    %47 = arith.maximumf %45, %46 : vector<128x128xf32>
    %c3_i32 = arith.constant 3 : i32
    %c0_23 = arith.constant 0 : index
    %c0_24 = arith.constant 0 : index
    %48 = vector.load %arg4[%c0_23, %c0_24] : memref<128x128xf32, #tpu.memory_space<vmem>>, vector<128x128xf32>
    tpu.vector_store %arg4[%c0_23, %c0_24], %47 {strides = array<i32>} : memref<128x128xf32, #tpu.memory_space<vmem>>, vector<128x128xf32>,
    return
  }
}

</mosaic_0001>

<bundles_post_ra>
// kernel: encoder_stack.1
= control target key start
LH: loop header
LB: loop body
LE: loop exit
PB: predicated region body
PF: predicated region fallthrough
CT: control target
= control target key end

     0   :  { %9 = vsyncpa [#allocation3], 0  ;;  %s2008_s0 = inlined_call_operand.hbm [shape: f32[128,128], index: 0, kind: input, shape index: {}]   ;;  %s2009_s1 = inlined_call_operand.hbm [shape: f32[128,128], index: 1, kind: input, shape index: {}]   ;;  %s2010_s2 = inlined_call_operand.hbm [shape: bf16[3,128,128], index: 2, kind: input, shape index: {}]   ;;  %s2011_s3 = inlined_call_operand.vmem [shape: f32[3,1,128], index: 3, kind: input, shape index: {}]   ;;  %s2012_s4 = inlined_call_operand.hbm [shape: f32[128,128], index: 4, kind: output, shape index: {}]  }
   0x1   :  { %10 = vsyncpa [#allocation6], 0 }
   0x2   :  { %11 = vsyncpa [#allocation4], 0  ;;  %s1520_s15 = smov [#allocation5]   ;;  %s1521_s17 = smov [#allocation2]  }
   0x3   :  { %s29_s16 = sshll.u32 %s1520_s15, 4  ;;  %s17_s18 = sshll.u32 %s1521_s17, 4  ;;  %s30_s16 = int_to_ptr.vmem [resolvable:$true] %s29_s16  ;;  %s1553_s18 = int_to_ptr.vmem [resolvable:$true] %s17_s18 }
   0x4   :  { %s1426_s21 = scalar_lea.hbm %s2009_s1, 2048 }
   0x5   :  { %p1427_p0 = scmp.ne.s32.totalorder %s2009_s1, %s1426_s21  ;;  %p1430_p1 = scmp.lt.u32.totalorder %s1426_s21, %s2009_s1 }
   0x7   :  { %p1432_p2 = pnand %p1430_p1, %p1427_p0 }
   0x9   :  { %1435 = shalt.err (!%p1432_p2)
}
   0xa   :  { %s1436_s26 = scalar_lea.vmem %s30_s16, 2048  ;;  %p1441_p4 = scmp.lt.s32.totalorder %s30_s16, %s30_s16 }
   0xb   :  { %p1437_p3 = scmp.ne.s32.totalorder %s30_s16, %s1436_s26  ;;  %p1442_p5 = scmp.lt.s32.totalorder %s1436_s26, %s1436_s26 }
   0xd   :  { %p1443_p6 = por %p1442_p5, %p1441_p4 }
   0xf   :  { %p1444_p7 = pnand %p1443_p6, %p1437_p3 }
  0x11   :  { %1447 = shalt.err (!%p1444_p7)
}
  0x12   :  { %s1522_s27 = smov 128   ;;  %s1523_s28 = smov 8  }
  0x13   :  { %35 = dma.hbm_to_vmem [thread:$0]  %s2009_s1, 2048, %s30_s16, [#allocation6], %s1522_s27, %s1522_s27, %s1523_s28  }
  0x14   :  { %s1448_s7 = scalar_lea.hbm %s2008_s0, 2048 }
  0x15   :  { %p1449_p8 = scmp.ne.s32.totalorder %s2008_s0, %s1448_s7  ;;  %p1452_p9 = scmp.lt.u32.totalorder %s1448_s7, %s2008_s0 }
  0x17   :  { %p1454_p10 = pnand %p1452_p9, %p1449_p8 }
  0x19   :  { %1457 = shalt.err (!%p1454_p10)
}
  0x1a   :  { %s1458_s12 = scalar_lea.vmem %s1553_s18, 2048  ;;  %p1463_p12 = scmp.lt.s32.totalorder %s1553_s18, %s1553_s18 }
  0x1b   :  { %p1459_p11 = scmp.ne.s32.totalorder %s1553_s18, %s1458_s12  ;;  %p1464_p13 = scmp.lt.s32.totalorder %s1458_s12, %s1458_s12 }
  0x1d   :  { %p1465_p0 = por %p1464_p13, %p1463_p12 }
  0x1f   :  { %p1466_p1 = pnand %p1465_p0, %p1459_p11 }
  0x21   :  { %1469 = shalt.err (!%p1466_p1)
}
  0x22   :  { %23 = dma.hbm_to_vmem [thread:$0]  %s2008_s0, 2048, %s1553_s18, [#allocation3], %s1522_s27, %s1522_s27, %s1523_s28  }
  0x23   :  { %s1524_s14 = smov [#allocation7]   ;;  %s1470_s19 = scalar_lea.hbm %s2010_s2, 3072 }
  0x24   :  { %s41_s15 = sshll.u32 %s1524_s14, 4  ;;  %p1471_p2 = scmp.ne.s32.totalorder %s2010_s2, %s1470_s19  ;;  %s42_s15 = int_to_ptr.vmem [resolvable:$true] %s41_s15 }
  0x25   :  { %p1474_p3 = scmp.lt.u32.totalorder %s1470_s19, %s2010_s2 }
  0x27   :  { %p1476_p4 = pnand %p1474_p3, %p1471_p2 }
  0x29   :  { %1479 = shalt.err (!%p1476_p4)
}
  0x2a   :  { %s1480_s24 = scalar_lea.vmem %s42_s15, 3072  ;;  %p1485_p6 = scmp.lt.s32.totalorder %s42_s15, %s42_s15 }
  0x2b   :  { %p1481_p5 = scmp.ne.s32.totalorder %s42_s15, %s1480_s24  ;;  %p1486_p7 = scmp.lt.s32.totalorder %s1480_s24, %s1480_s24 }
  0x2d   :  { %p1487_p8 = por %p1486_p7, %p1485_p6 }
  0x2f   :  { %p1488_p9 = pnand %p1487_p8, %p1481_p5 }
  0x31   :  { %1491 = shalt.err (!%p1488_p9)
}
  0x32   :  { %s1525_s0 = smov 64   ;;  %s1526_s18 = smov 4  }
  0x33   :  { %47 = dma.hbm_to_vmem [thread:$0]  %s2010_s2, 3072, %s42_s15, [#allocation6], %s1525_s0, %s1525_s0, %s1526_s18  }
  0x34   :  { %1514 = dma.done.wait [#allocation3], 2048  }
  0x35   :  { %1515 = vsyncadd [#allocation3], 4294965248 }
  0x36   :  { %1516 = dma.done.wait [#allocation6], 5120  }
  0x37   :  { %1517 = vsyncadd [#allocation6], 4294962176  ;;  %v1602_v0 = vld [vmem:[#allocation2] sm:$0xff]  ;;  %v1604_v1 = vld [vmem:[#allocation2 + $0x8] sm:$0xff] }
  0x38   :  { %v1606_v2 = vld [vmem:[#allocation2 + $0x10] sm:$0xff]  ;;  %v117_v3 = vpack.c.bf16 %v1604_v1, %v1602_v0  ;;  %v1610_v4 = vld [vmem:[#allocation2 + $0x18] sm:$0xff]  ;;  %v1614_v6 = vld [vmem:[#allocation2 + $0x20] sm:$0xff] }
  0x39   :  { %v118_v5 = vpack.c.bf16 %v1610_v4, %v1606_v2  ;;  %v1616_v7 = vld [vmem:[#allocation2 + $0x28] sm:$0xff]  ;;  %v60_v9 = vld [vmem:[#allocation5] sm:$0xff]  ;;  %v1620_v11 = vld [vmem:[#allocation2 + $0x30] sm:$0xff] }
  0x3a   :  { %1202 = vmatprep.subr.bf16.mxu0 %v117_v3  ;;  %v119_v8 = vpack.c.bf16 %v1616_v7, %v1614_v6  ;;  %v61_v10 = vld [vmem:[#allocation5 + $0x8] sm:$0xff]  ;;  %v1622_v12 = vld [vmem:[#allocation2 + $0x38] sm:$0xff]  ;;  %v1629_v15 = vld [vmem:[#allocation2 + $0x40] sm:$0xff] }
  0x3b   :  { %1203 = vmatpush3.bf16.msra.mxu0 %v117_v3  ;;  %v1624_v13 = vpack.c.bf16 %v61_v10, %v60_v9  ;;  %v120_v14 = vpack.c.bf16 %v1622_v12, %v1620_v11  ;;  %v1631_v16 = vld [vmem:[#allocation2 + $0x48] sm:$0xff]  ;;  %v1402_v17 = vld [vmem:[#allocation7] sm:$0xff]   ;;  %v1635_v20 = vld [vmem:[#allocation2 + $0x50] sm:$0xff] }
  0x3c   :  { %1204 = vmatprep.subr.bf16.mxu0 %v118_v5  ;;  %v1403_v18 = vld [vmem:[#allocation7 + $0x8] sm:$0xff]   ;;  %v121_v19 = vpack.c.bf16 %v1631_v16, %v1629_v15  ;;  %1234 = vmatprep.subr.bf16.mxu1 %v1402_v17  ;;  %v1637_v21 = vld [vmem:[#allocation2 + $0x58] sm:$0xff]  ;;  %v1404_v22 = vld [vmem:[#allocation7 + $0x10] sm:$0xff]  }
  0x3d   :  { %1218 = vmatprep.mubr.bf16.mxu0 %v1624_v13  ;;  %1235 = vmatpush3.bf16.msra.mxu1 %v1402_v17  ;;  %v1639_v23 = vld [vmem:[#allocation2 + $0x60] sm:$0xff]  ;;  %v1641_v24 = vld [vmem:[#allocation2 + $0x68] sm:$0xff]  ;;  %v122_v25 = vpack.c.bf16 %v1637_v21, %v1635_v20  ;;  %v1405_v26 = vld [vmem:[#allocation7 + $0x18] sm:$0xff]  }
  0x3e   :  { %1236 = vmatprep.subr.bf16.mxu1 %v1403_v18  ;;  %v1645_v27 = vld [vmem:[#allocation2 + $0x70] sm:$0xff]  ;;  %v1647_v28 = vld [vmem:[#allocation2 + $0x78] sm:$0xff]  ;;  %v123_v29 = vpack.c.bf16 %v1641_v24, %v1639_v23  ;;  %v1406_v30 = vld [vmem:[#allocation7 + $0x20] sm:$0xff]  }
  0x3f   :  { %1205 = vmatpush3.bf16.msra.mxu0 %v118_v5  ;;  %v124_v31 = vpack.c.bf16 %v1647_v28, %v1645_v27  ;;  %v1407_v32 = vld [vmem:[#allocation7 + $0x28] sm:$0xff]   ;;  %v62_v33 = vld [vmem:[#allocation5 + $0x10] sm:$0xff]  ;;  %v63_v34 = vld [vmem:[#allocation5 + $0x18] sm:$0xff] }
  0x40   :  { %1206 = vmatprep.subr.bf16.mxu0 %v119_v8  ;;  %v64_v35 = vld [vmem:[#allocation5 + $0x20] sm:$0xff]  ;;  %v65_v36 = vld [vmem:[#allocation5 + $0x28] sm:$0xff]  ;;  %v1653_v37 = vpack.c.bf16 %v63_v34, %v62_v33  ;;  %v1408_v38 = vld [vmem:[#allocation7 + $0x30] sm:$0xff]  }
  0x41   :  { %1237 = vmatpush3.bf16.msra.mxu1 %v1403_v18  ;;  %v1655_v39 = vpack.c.bf16 %v65_v36, %v64_v35  ;;  %v66_v40 = vld [vmem:[#allocation5 + $0x30] sm:$0xff]  ;;  %v67_v41 = vld [vmem:[#allocation5 + $0x38] sm:$0xff]  ;;  %v68_v42 = vld [vmem:[#allocation5 + $0x40] sm:$0xff] }
  0x42   :  { %1238 = vmatprep.subr.bf16.mxu1 %v1404_v22  ;;  %v69_v43 = vld [vmem:[#allocation5 + $0x48] sm:$0xff]  ;;  %v1659_v44 = vpack.c.bf16 %v67_v41, %v66_v40  ;;  %v70_v46 = vld [vmem:[#allocation5 + $0x50] sm:$0xff]  ;;  %v71_v47 = vld [vmem:[#allocation5 + $0x58] sm:$0xff] }
  0x43   :  { %1207 = vmatpush3.bf16.msra.mxu0 %v119_v8  ;;  %v1661_v45 = vpack.c.bf16 %v69_v43, %v68_v42  ;;  %v72_v48 = vld [vmem:[#allocation5 + $0x60] sm:$0xff]  ;;  %v73_v49 = vld [vmem:[#allocation5 + $0x68] sm:$0xff]  ;;  %v1665_v50 = vpack.c.bf16 %v71_v47, %v70_v46  ;;  %v74_v52 = vld [vmem:[#allocation5 + $0x70] sm:$0xff] }
  0x44   :  { %1208 = vmatprep.subr.bf16.mxu0 %v120_v14  ;;  %v1667_v51 = vpack.c.bf16 %v73_v49, %v72_v48  ;;  %v75_v53 = vld [vmem:[#allocation5 + $0x78] sm:$0xff]  ;;  %v1410_v33 = vld [vmem:[#allocation7 + $0x40] sm:$0xff]   ;;  %v1411_v34 = vld [vmem:[#allocation7 + $0x48] sm:$0xff]  }
  0x45   :  { %1239 = vmatpush3.bf16.msra.mxu1 %v1404_v22  ;;  %v1671_v54 = vpack.c.bf16 %v75_v53, %v74_v52  ;;  %v1409_v55 = vld [vmem:[#allocation7 + $0x38] sm:$0xff]   ;;  %v1412_v35 = vld [vmem:[#allocation7 + $0x50] sm:$0xff]   ;;  %v1415_v40 = vld [vmem:[#allocation7 + $0x68] sm:$0xff]  }
  0x46   :  { %1240 = vmatprep.subr.bf16.mxu1 %v1405_v26  ;;  %v1413_v36 = vld [vmem:[#allocation7 + $0x58] sm:$0xff]   ;;  %v1416_v41 = vld [vmem:[#allocation7 + $0x70] sm:$0xff]   ;;  %v1678_v42 = vld [vmem:[%s2011_s3] ss:$0 sm:$0xff] }
  0x47   :  { %1209 = vmatpush3.bf16.msra.mxu0 %v120_v14 }
  0x48   :  { %1210 = vmatprep.subr.bf16.mxu0 %v121_v19 }
  0x49   :  { %1241 = vmatpush3.bf16.msra.mxu1 %v1405_v26 }
  0x4a   :  { %1242 = vmatprep.subr.bf16.mxu1 %v1406_v30 }
  0x4b   :  { %1211 = vmatpush3.bf16.msra.mxu0 %v121_v19 }
  0x4c   :  { %1212 = vmatprep.subr.bf16.mxu0 %v122_v25 }
  0x4d   :  { %1243 = vmatpush3.bf16.msra.mxu1 %v1406_v30 }
  0x4e   :  { %1244 = vmatprep.subr.bf16.mxu1 %v1407_v32 }
  0x4f   :  { %1213 = vmatpush3.bf16.msra.mxu0 %v122_v25 }
  0x50   :  { %1214 = vmatprep.subr.bf16.mxu0 %v123_v29 }
  0x51   :  { %1245 = vmatpush3.bf16.msra.mxu1 %v1407_v32 }
  0x52   :  { %1246 = vmatprep.subr.bf16.mxu1 %v1408_v38 }
  0x53   :  { %1215 = vmatpush3.bf16.msra.mxu0 %v123_v29 }
  0x54   :  { %1216 = vmatprep.subr.bf16.mxu0 %v124_v31 }
  0x55   :  { %1247 = vmatpush3.bf16.msra.mxu1 %v1408_v38  ;;  %v1414_v38 = vld [vmem:[#allocation7 + $0x60] sm:$0xff]  }
  0x56   :  { %1248 = vmatprep.subr.bf16.mxu1 %v1409_v55 }
  0x57   :  { %1217 = vmatpush3.bf16.msra.mxu0 %v124_v31 }
  0x59   :  { %1249 = vmatpush3.bf16.msra.mxu1 %v1409_v55 }
  0x5a   :  { %1219 = vmatmul.mubr.bf16.vlgmr.msra.gmra.mrb[0].mxu0 %v1653_v37  ;;  %1298 = vmatprep.subr.bf16.mxu1 %v1410_v33 }
  0x5b   :  { %1222 = vmatprep.mubr.bf16.mxu0 %v1655_v39 }
  0x62   :  { %1223 = vmatmul.mubr.bf16.gmra.mrb[4].mxu0 %v1659_v44 }
  0x63   :  { %1226 = vmatprep.mubr.bf16.mxu0 %v1661_v45 }
  0x6a   :  { %1227 = vmatmul.mubr.bf16.gmra.mrb[8].mxu0 %v1665_v50 }
  0x6b   :  { %1230 = vmatprep.mubr.bf16.mxu0 %v1667_v51 }
  0x72   :  { %1231 = vmatmul.mubr.bf16.gmra.mrb[12].mxu0 %v1671_v54 }
  0x73   :  { %1282 = vmatprep.mubr.bf16.mxu0 %v1624_v13 }
 0x12d   :  { %v1220_v56 = vpop.f32.mrb[0].mxu0 }
 0x12e   :  { %v159_v57 = vpop.f32.mrb[1].mxu0 }
 0x12f   :  { %v1221_v58 = vpop.f32.mrb[2].mxu0 }
 0x130   :  { %v223_v59 = vpack.c.bf16 %v1221_v58, %v1220_v56  ;;  %v162_v60 = vpop.f32.mrb[3].mxu0 }
 0x131   :  { %v222_v61 = vpack.c.bf16 %v162_v60, %v159_v57 }
 0x133   :  { %1250 = vmatprep.mubr.bf16.mxu1 %v222_v61 }
 0x134   :  { %1251 = vmatmul.mubr.bf16.vlgmr.msra.gmra.mrb[0].mxu1 %v223_v59 }
 0x135   :  { %v1224_v62 = vpop.f32.mrb[4].mxu0  ;;  %1299 = vmatpush3.bf16.msra.mxu1 %v1410_v33 }
 0x136   :  { %v175_v63 = vpop.f32.mrb[5].mxu0  ;;  %1300 = vmatprep.subr.bf16.mxu1 %v1411_v34 }
 0x137   :  { %v1225_v3 = vpop.f32.mrb[6].mxu0 }
 0x138   :  { %v225_v5 = vpack.c.bf16 %v1225_v3, %v1224_v62  ;;  %v178_v8 = vpop.f32.mrb[7].mxu0 }
 0x139   :  { %v224_v9 = vpack.c.bf16 %v178_v8, %v175_v63  ;;  %1301 = vmatpush3.bf16.msra.mxu1 %v1411_v34 }
 0x13a   :  { %1302 = vmatprep.subr.bf16.mxu1 %v1412_v35 }
 0x13b   :  { %1254 = vmatprep.mubr.bf16.mxu1 %v224_v9 }
 0x13c   :  { %1255 = vmatmul.mubr.bf16.gmra.mrb[4].mxu1 %v225_v5 }
 0x13d   :  { %v1228_v10 = vpop.f32.mrb[8].mxu0  ;;  %1303 = vmatpush3.bf16.msra.mxu1 %v1412_v35 }
 0x13e   :  { %v191_v14 = vpop.f32.mrb[9].mxu0  ;;  %1304 = vmatprep.subr.bf16.mxu1 %v1413_v36 }
 0x13f   :  { %v1229_v17 = vpop.f32.mrb[10].mxu0 }
 0x140   :  { %v227_v18 = vpack.c.bf16 %v1229_v17, %v1228_v10  ;;  %v194_v19 = vpop.f32.mrb[11].mxu0 }
 0x141   :  { %v226_v22 = vpack.c.bf16 %v194_v19, %v191_v14  ;;  %1305 = vmatpush3.bf16.msra.mxu1 %v1413_v36 }
 0x142   :  { %1306 = vmatprep.subr.bf16.mxu1 %v1414_v38 }
 0x143   :  { %1258 = vmatprep.mubr.bf16.mxu1 %v226_v22 }
 0x144   :  { %1259 = vmatmul.mubr.bf16.gmra.mrb[8].mxu1 %v227_v18 }
 0x145   :  { %v1232_v25 = vpop.f32.mrb[12].mxu0  ;;  %1307 = vmatpush3.bf16.msra.mxu1 %v1414_v38 }
 0x146   :  { %v207_v26 = vpop.f32.mrb[13].mxu0  ;;  %1308 = vmatprep.subr.bf16.mxu1 %v1415_v40 }
 0x147   :  { %v1233_v29 = vpop.f32.mrb[14].mxu0 }
 0x148   :  { %v229_v30 = vpack.c.bf16 %v1233_v29, %v1232_v25  ;;  %v210_v31 = vpop.f32.mrb[15].mxu0 }
 0x149   :  { %v228_v32 = vpack.c.bf16 %v210_v31, %v207_v26  ;;  %1309 = vmatpush3.bf16.msra.mxu1 %v1415_v40 }
 0x14a   :  { %1310 = vmatprep.subr.bf16.mxu1 %v1416_v41 }
 0x14b   :  { %1262 = vmatprep.mubr.bf16.mxu1 %v228_v32 }
 0x14c   :  { %1263 = vmatmul.mubr.bf16.gmra.mrb[12].mxu1 %v229_v30 }
 0x14d   :  { %1311 = vmatpush3.bf16.msra.mxu1 %v1416_v41 }
 0x207   :  { %v1252_v43 = vpop.f32.mrb[0].mxu1 }
 0x208   :  { %v318_v46 = vpop.f32.mrb[1].mxu1  ;;  %v327_v47 = vadd.f32 %v1252_v43, %v1678_v42 }
 0x209   :  { %v319_v48 = vadd.f32 %v1678_v42, %v318_v46  ;;  %v1253_v49 = vpop.f32.mrb[2].mxu1 }
 0x20a   :  { %v330_v52 = vadd.f32 %v1253_v49, %v1678_v42  ;;  %v321_v53 = vpop.f32.mrb[3].mxu1  ;;  %v1691_v58 = vadd.f32 %v327_v47, %v1606_v2 }
 0x20b   :  { %v1684_v55 = vadd.f32 %v319_v48, %v1602_v0  ;;  %v322_v56 = vadd.f32 %v1678_v42, %v321_v53 }
 0x20c   :  { %v1688_v57 = vadd.f32 %v330_v52, %v1610_v4  ;;  %v399_v3 = vmax.f32 %v1691_v58, 0.0 }
 0x20d   :  { %v1694_v59 = vadd.f32 %v322_v56, %v1604_v1  ;;  %v397_v60 = vmax.f32 %v1684_v55, 0.0 }
 0x20e   :  { %v400_v61 = vmax.f32 %v1688_v57, 0.0 }
 0x20f   :  { %v398_v62 = vmax.f32 %v1694_v59, 0.0  ;;  %v1256_v63 = vpop.f32.mrb[4].mxu1 }
 0x210   :  { %v334_v0 = vpop.f32.mrb[5].mxu1  ;;  %v343_v5 = vadd.f32 %v1256_v63, %v1678_v42  ;;  %v433_v17 = vpack.c.bf16 %v400_v61, %v399_v3 }
 0x211   :  { %v335_v4 = vadd.f32 %v1678_v42, %v334_v0  ;;  %v1257_v8 = vpop.f32.mrb[6].mxu1  ;;  %v432_v1 = vpack.c.bf16 %v398_v62, %v397_v60 }
 0x212   :  { %v346_v2 = vadd.f32 %v1257_v8, %v1678_v42  ;;  %v337_v9 = vpop.f32.mrb[7].mxu1  ;;  %v1719_v19 = vadd.f32 %v343_v5, %v1620_v11 }
 0x213   :  { %v1708_v10 = vadd.f32 %v335_v4, %v1614_v6  ;;  %v338_v14 = vadd.f32 %v1678_v42, %v337_v9  ;;  %1266 = vmatprep.subr.bf16.mxu0 %v432_v1 }
 0x214   :  { %v1716_v18 = vadd.f32 %v346_v2, %v1622_v12  ;;  %1267 = vmatpush3.bf16.msra.mxu0 %v432_v1  ;;  %v403_v12 = vmax.f32 %v1719_v19, 0.0 }
 0x215   :  { %v1722_v22 = vadd.f32 %v338_v14, %v1616_v7  ;;  %1268 = vmatprep.subr.bf16.mxu0 %v433_v17  ;;  %v401_v6 = vmax.f32 %v1708_v10, 0.0 }
 0x216   :  { %v404_v25 = vmax.f32 %v1716_v18, 0.0 }
 0x217   :  { %v402_v26 = vmax.f32 %v1722_v22, 0.0  ;;  %v1260_v29 = vpop.f32.mrb[8].mxu1 }
 0x218   :  { %v350_v30 = vpop.f32.mrb[9].mxu1  ;;  %1269 = vmatpush3.bf16.msra.mxu0 %v433_v17  ;;  %v359_v31 = vadd.f32 %v1260_v29, %v1678_v42  ;;  %v435_v38 = vpack.c.bf16 %v404_v25, %v403_v12 }
 0x219   :  { %v351_v11 = vadd.f32 %v1678_v42, %v350_v30  ;;  %v1261_v32 = vpop.f32.mrb[10].mxu1  ;;  %v434_v7 = vpack.c.bf16 %v402_v26, %v401_v6 }
 0x21a   :  { %v362_v33 = vadd.f32 %v1261_v32, %v1678_v42  ;;  %v353_v34 = vpop.f32.mrb[11].mxu1  ;;  %v1747_v41 = vadd.f32 %v359_v31, %v1635_v20 }
 0x21b   :  { %v1736_v35 = vadd.f32 %v351_v11, %v1629_v15  ;;  %v354_v36 = vadd.f32 %v1678_v42, %v353_v34  ;;  %1270 = vmatprep.subr.bf16.mxu0 %v434_v7 }
 0x21c   :  { %v1744_v40 = vadd.f32 %v362_v33, %v1637_v21  ;;  %1271 = vmatpush3.bf16.msra.mxu0 %v434_v7  ;;  %v407_v21 = vmax.f32 %v1747_v41, 0.0 }
 0x21d   :  { %v1750_v43 = vadd.f32 %v354_v36, %v1631_v16  ;;  %1272 = vmatprep.subr.bf16.mxu0 %v435_v38  ;;  %v405_v15 = vmax.f32 %v1736_v35, 0.0 }
 0x21e   :  { %v408_v46 = vmax.f32 %v1744_v40, 0.0 }
 0x21f   :  { %v406_v47 = vmax.f32 %v1750_v43, 0.0  ;;  %v1264_v48 = vpop.f32.mrb[12].mxu1 }
 0x220   :  { %v366_v49 = vpop.f32.mrb[13].mxu1  ;;  %1273 = vmatpush3.bf16.msra.mxu0 %v435_v38  ;;  %v375_v52 = vadd.f32 %v1264_v48, %v1678_v42  ;;  %v437_v4 = vpack.c.bf16 %v408_v46, %v407_v21 }
 0x221   :  { %v367_v20 = vadd.f32 %v1678_v42, %v366_v49  ;;  %v1265_v53 = vpop.f32.mrb[14].mxu1  ;;  %v436_v16 = vpack.c.bf16 %v406_v47, %v405_v15 }
 0x222   :  { %v378_v56 = vadd.f32 %v1265_v53, %v1678_v42  ;;  %v369_v63 = vpop.f32.mrb[15].mxu1  ;;  %v1775_v1 = vadd.f32 %v375_v52, %v1645_v27  ;;  %v1417_v27 = vld [vmem:[#allocation7 + $0x78] sm:$0xff]  }
 0x223   :  { %v1764_v0 = vadd.f32 %v367_v20, %v1639_v23  ;;  %v370_v5 = vadd.f32 %v1678_v42, %v369_v63  ;;  %1274 = vmatprep.subr.bf16.mxu0 %v436_v16  ;;  %1312 = vmatprep.subr.bf16.mxu1 %v1417_v27 }
 0x224   :  { %v1772_v8 = vadd.f32 %v378_v56, %v1647_v28  ;;  %1275 = vmatpush3.bf16.msra.mxu0 %v436_v16  ;;  %v411_v14 = vmax.f32 %v1775_v1, 0.0  ;;  %1313 = vmatpush3.bf16.msra.mxu1 %v1417_v27  ;;  %v1418_v27 = vld [vmem:[#allocation7 + $0x80] sm:$0xff]  }
 0x225   :  { %v1778_v2 = vadd.f32 %v370_v5, %v1641_v24  ;;  %1276 = vmatprep.subr.bf16.mxu0 %v437_v4  ;;  %v409_v23 = vmax.f32 %v1764_v0, 0.0  ;;  %1362 = vmatprep.subr.bf16.mxu1 %v1418_v27 }
 0x226   :  { %v412_v42 = vmax.f32 %v1772_v8, 0.0 }
 0x227   :  { %v410_v9 = vmax.f32 %v1778_v2, 0.0 }
 0x228   :  { %1277 = vmatpush3.bf16.msra.mxu0 %v437_v4  ;;  %v439_v24 = vpack.c.bf16 %v412_v42, %v411_v14 }
 0x229   :  { %v438_v28 = vpack.c.bf16 %v410_v9, %v409_v23 }
 0x22b   :  { %1278 = vmatprep.subr.bf16.mxu0 %v438_v28 }
 0x22c   :  { %1279 = vmatpush3.bf16.msra.mxu0 %v438_v28 }
 0x22d   :  { %1280 = vmatprep.subr.bf16.mxu0 %v439_v24 }
 0x230   :  { %1281 = vmatpush3.bf16.msra.mxu0 %v439_v24 }
 0x233   :  { %1283 = vmatmul.mubr.bf16.vlgmr.msra.gmra.mrb[16].mxu0 %v1653_v37 }
 0x234   :  { %1286 = vmatprep.mubr.bf16.mxu0 %v1655_v39 }
 0x23b   :  { %1287 = vmatmul.mubr.bf16.gmra.mrb[20].mxu0 %v1659_v44 }
 0x23c   :  { %1290 = vmatprep.mubr.bf16.mxu0 %v1661_v45 }
 0x243   :  { %1291 = vmatmul.mubr.bf16.gmra.mrb[24].mxu0 %v1665_v50 }
 0x244   :  { %1294 = vmatprep.mubr.bf16.mxu0 %v1667_v51 }
 0x24b   :  { %1295 = vmatmul.mubr.bf16.gmra.mrb[28].mxu0 %v1671_v54 }
 0x24c   :  { %1346 = vmatprep.mubr.bf16.mxu0 %v1624_v13 }
 0x306   :  { %v1284_v17 = vpop.f32.mrb[16].mxu0 }
 0x307   :  { %v474_v29 = vpop.f32.mrb[17].mxu0 }
 0x308   :  { %v1285_v30 = vpop.f32.mrb[18].mxu0 }
 0x309   :  { %v538_v31 = vpack.c.bf16 %v1285_v30, %v1284_v17  ;;  %v477_v11 = vpop.f32.mrb[19].mxu0  ;;  %v1419_v17 = vld [vmem:[#allocation7 + $0x88] sm:$0xff]   ;;  %v1421_v30 = vld [vmem:[#allocation7 + $0x98] sm:$0xff]  }
 0x30a   :  { %v537_v32 = vpack.c.bf16 %v477_v11, %v474_v29  ;;  %v1420_v29 = vld [vmem:[#allocation7 + $0x90] sm:$0xff]   ;;  %v1423_v11 = vld [vmem:[#allocation7 + $0xa8] sm:$0xff]  }
 0x30c   :  { %1314 = vmatprep.mubr.bf16.mxu1 %v537_v32  ;;  %v1424_v32 = vld [vmem:[#allocation7 + $0xb0] sm:$0xff]  }
 0x30d   :  { %1315 = vmatmul.mubr.bf16.vlgmr.msra.gmra.mrb[16].mxu1 %v538_v31  ;;  %v1422_v31 = vld [vmem:[#allocation7 + $0xa0] sm:$0xff]  }
 0x30e   :  { %v1288_v7 = vpop.f32.mrb[20].mxu0  ;;  %1363 = vmatpush3.bf16.msra.mxu1 %v1418_v27 }
 0x30f   :  { %v490_v33 = vpop.f32.mrb[21].mxu0  ;;  %1364 = vmatprep.subr.bf16.mxu1 %v1419_v17 }
 0x310   :  { %v1289_v34 = vpop.f32.mrb[22].mxu0 }
 0x311   :  { %v540_v36 = vpack.c.bf16 %v1289_v34, %v1288_v7  ;;  %v493_v38 = vpop.f32.mrb[23].mxu0  ;;  %v1803_v7 = vld [vmem:[%s2011_s3 + $0x1] ss:$0 sm:$0xff] }
 0x312   :  { %v539_v48 = vpack.c.bf16 %v493_v38, %v490_v33  ;;  %1365 = vmatpush3.bf16.msra.mxu1 %v1419_v17 }
 0x313   :  { %1366 = vmatprep.subr.bf16.mxu1 %v1420_v29 }
 0x314   :  { %1318 = vmatprep.mubr.bf16.mxu1 %v539_v48 }
 0x315   :  { %1319 = vmatmul.mubr.bf16.gmra.mrb[20].mxu1 %v540_v36 }
 0x316   :  { %v1292_v13 = vpop.f32.mrb[24].mxu0  ;;  %1367 = vmatpush3.bf16.msra.mxu1 %v1420_v29 }
 0x317   :  { %v506_v49 = vpop.f32.mrb[25].mxu0  ;;  %1368 = vmatprep.subr.bf16.mxu1 %v1421_v30 }
 0x318   :  { %v1293_v52 = vpop.f32.mrb[26].mxu0 }
 0x319   :  { %v542_v20 = vpack.c.bf16 %v1293_v52, %v1292_v13  ;;  %v509_v53 = vpop.f32.mrb[27].mxu0 }
 0x31a   :  { %v541_v16 = vpack.c.bf16 %v509_v53, %v506_v49  ;;  %1369 = vmatpush3.bf16.msra.mxu1 %v1421_v30 }
 0x31b   :  { %1370 = vmatprep.subr.bf16.mxu1 %v1422_v31 }
 0x31c   :  { %1322 = vmatprep.mubr.bf16.mxu1 %v541_v16 }
 0x31d   :  { %1323 = vmatmul.mubr.bf16.gmra.mrb[24].mxu1 %v542_v20 }
 0x31e   :  { %v1296_v56 = vpop.f32.mrb[28].mxu0  ;;  %1371 = vmatpush3.bf16.msra.mxu1 %v1422_v31 }
 0x31f   :  { %v522_v63 = vpop.f32.mrb[29].mxu0  ;;  %1372 = vmatprep.subr.bf16.mxu1 %v1423_v11 }
 0x320   :  { %v1297_v5 = vpop.f32.mrb[30].mxu0 }
 0x321   :  { %v544_v4 = vpack.c.bf16 %v1297_v5, %v1296_v56  ;;  %v525_v28 = vpop.f32.mrb[31].mxu0 }
 0x322   :  { %v543_v24 = vpack.c.bf16 %v525_v28, %v522_v63  ;;  %1373 = vmatpush3.bf16.msra.mxu1 %v1423_v11 }
 0x323   :  { %1374 = vmatprep.subr.bf16.mxu1 %v1424_v32 }
 0x324   :  { %1326 = vmatprep.mubr.bf16.mxu1 %v543_v24 }
 0x325   :  { %1327 = vmatmul.mubr.bf16.gmra.mrb[28].mxu1 %v544_v4 }
 0x326   :  { %1375 = vmatpush3.bf16.msra.mxu1 %v1424_v32 }
 0x3e0   :  { %v1316_v33 = vpop.f32.mrb[16].mxu1 }
 0x3e1   :  { %v633_v34 = vpop.f32.mrb[17].mxu1  ;;  %v642_v36 = vadd.f32 %v1316_v33, %v1803_v7 }
 0x3e2   :  { %v634_v38 = vadd.f32 %v1803_v7, %v633_v34  ;;  %v1317_v48 = vpop.f32.mrb[18].mxu1 }
 0x3e3   :  { %v645_v13 = vadd.f32 %v1317_v48, %v1803_v7  ;;  %v636_v49 = vpop.f32.mrb[19].mxu1  ;;  %v1819_v16 = vadd.f32 %v642_v36, %v399_v3 }
 0x3e4   :  { %v1810_v52 = vadd.f32 %v634_v38, %v397_v60  ;;  %v637_v20 = vadd.f32 %v1803_v7, %v636_v49 }
 0x3e5   :  { %v1815_v53 = vadd.f32 %v645_v13, %v400_v61  ;;  %v714_v57 = vmax.f32 %v1819_v16, 0.0 }
 0x3e6   :  { %v1823_v56 = vadd.f32 %v637_v20, %v398_v62  ;;  %v712_v63 = vmax.f32 %v1810_v52, 0.0 }
 0x3e7   :  { %v715_v55 = vmax.f32 %v1815_v53, 0.0 }
 0x3e8   :  { %v713_v60 = vmax.f32 %v1823_v56, 0.0  ;;  %v1320_v5 = vpop.f32.mrb[20].mxu1 }
 0x3e9   :  { %v649_v4 = vpop.f32.mrb[21].mxu1  ;;  %v658_v61 = vadd.f32 %v1320_v5, %v1803_v7  ;;  %v748_v17 = vpack.c.bf16 %v715_v55, %v714_v57 }
 0x3ea   :  { %v650_v58 = vadd.f32 %v1803_v7, %v649_v4  ;;  %v1321_v3 = vpop.f32.mrb[22].mxu1  ;;  %v747_v59 = vpack.c.bf16 %v713_v60, %v712_v63 }
 0x3eb   :  { %v661_v62 = vadd.f32 %v1321_v3, %v1803_v7  ;;  %v652_v28 = vpop.f32.mrb[23].mxu1  ;;  %v1851_v30 = vadd.f32 %v658_v61, %v403_v12 }
 0x3ec   :  { %v1838_v24 = vadd.f32 %v650_v58, %v401_v6  ;;  %v653_v27 = vadd.f32 %v1803_v7, %v652_v28  ;;  %1330 = vmatprep.subr.bf16.mxu0 %v747_v59 }
 0x3ed   :  { %v1847_v29 = vadd.f32 %v661_v62, %v404_v25  ;;  %1331 = vmatpush3.bf16.msra.mxu0 %v747_v59  ;;  %v718_v25 = vmax.f32 %v1851_v30, 0.0 }
 0x3ee   :  { %v1855_v10 = vadd.f32 %v653_v27, %v402_v26  ;;  %1332 = vmatprep.subr.bf16.mxu0 %v748_v17  ;;  %v716_v6 = vmax.f32 %v1838_v24, 0.0 }
 0x3ef   :  { %v719_v31 = vmax.f32 %v1847_v29, 0.0 }
 0x3f0   :  { %v717_v11 = vmax.f32 %v1855_v10, 0.0  ;;  %v1324_v32 = vpop.f32.mrb[24].mxu1 }
 0x3f1   :  { %v665_v18 = vpop.f32.mrb[25].mxu1  ;;  %1333 = vmatpush3.bf16.msra.mxu0 %v748_v17  ;;  %v674_v19 = vadd.f32 %v1324_v32, %v1803_v7  ;;  %v750_v48 = vpack.c.bf16 %v719_v31, %v718_v25 }
 0x3f2   :  { %v666_v12 = vadd.f32 %v1803_v7, %v665_v18  ;;  %v1325_v33 = vpop.f32.mrb[26].mxu1  ;;  %v749_v22 = vpack.c.bf16 %v717_v11, %v716_v6 }
 0x3f3   :  { %v677_v26 = vadd.f32 %v1325_v33, %v1803_v7  ;;  %v668_v34 = vpop.f32.mrb[27].mxu1  ;;  %v1883_v49 = vadd.f32 %v674_v19, %v407_v21 }
 0x3f4   :  { %v1870_v36 = vadd.f32 %v666_v12, %v405_v15  ;;  %v669_v38 = vadd.f32 %v1803_v7, %v668_v34  ;;  %1334 = vmatprep.subr.bf16.mxu0 %v749_v22 }
 0x3f5   :  { %v1879_v13 = vadd.f32 %v677_v26, %v408_v46  ;;  %1335 = vmatpush3.bf16.msra.mxu0 %v749_v22  ;;  %v722_v46 = vmax.f32 %v1883_v49, 0.0 }
 0x3f6   :  { %v1887_v35 = vadd.f32 %v669_v38, %v406_v47  ;;  %1336 = vmatprep.subr.bf16.mxu0 %v750_v48  ;;  %v720_v15 = vmax.f32 %v1870_v36, 0.0 }
 0x3f7   :  { %v723_v20 = vmax.f32 %v1879_v13, 0.0 }
 0x3f8   :  { %v721_v5 = vmax.f32 %v1887_v35, 0.0  ;;  %v1328_v4 = vpop.f32.mrb[28].mxu1 }
 0x3f9   :  { %v681_v40 = vpop.f32.mrb[29].mxu1  ;;  %1337 = vmatpush3.bf16.msra.mxu0 %v750_v48  ;;  %v690_v41 = vadd.f32 %v1328_v4, %v1803_v7  ;;  %v752_v62 = vpack.c.bf16 %v723_v20, %v722_v46 }
 0x3fa   :  { %v682_v21 = vadd.f32 %v1803_v7, %v681_v40  ;;  %v1329_v61 = vpop.f32.mrb[30].mxu1  ;;  %v751_v43 = vpack.c.bf16 %v721_v5, %v720_v15 }
 0x3fb   :  { %v693_v47 = vadd.f32 %v1329_v61, %v1803_v7  ;;  %v684_v58 = vpop.f32.mrb[31].mxu1  ;;  %v1915_v27 = vadd.f32 %v690_v41, %v411_v14 }
 0x3fc   :  { %v1902_v3 = vadd.f32 %v682_v21, %v409_v23  ;;  %v685_v59 = vadd.f32 %v1803_v7, %v684_v58  ;;  %1338 = vmatprep.subr.bf16.mxu0 %v751_v43 }
 0x3fd   :  { %v1911_v28 = vadd.f32 %v693_v47, %v412_v42  ;;  %1339 = vmatpush3.bf16.msra.mxu0 %v751_v43  ;;  %v726_v8 = vmax.f32 %v1915_v27, 0.0  ;;  %v1425_v42 = vld [vmem:[#allocation7 + $0xb8] sm:$0xff]   ;;  %v1943_v43 = vld [vmem:[%s2011_s3 + $0x2] ss:$0 sm:$0xff]  ;;  %s1527_s3 = smov [#allocation8]  }
 0x3fe   :  { %v1919_v0 = vadd.f32 %v685_v59, %v410_v9  ;;  %1340 = vmatprep.subr.bf16.mxu0 %v752_v62  ;;  %v724_v23 = vmax.f32 %v1902_v3, 0.0  ;;  %1376 = vmatprep.subr.bf16.mxu1 %v1425_v42  ;;  %s1064_s8 = sshll.u32 %s1527_s3, 4  ;;  %s1065_s8 = int_to_ptr.vmem [resolvable:$true] %s1064_s8 }
 0x3ff   :  { %v727_v7 = vmax.f32 %v1911_v28, 0.0  ;;  %1377 = vmatpush3.bf16.msra.mxu1 %v1425_v42  ;;  %s1492_s9 = scalar_lea.vmem %s1065_s8, 2048  ;;  %p1497_p11 = scmp.lt.s32.totalorder %s1065_s8, %s1065_s8 }
 0x400   :  { %v725_v17 = vmax.f32 %v1919_v0, 0.0  ;;  %p1493_p10 = scmp.ne.s32.totalorder %s1065_s8, %s1492_s9  ;;  %p1498_p12 = scmp.lt.s32.totalorder %s1492_s9, %s1492_s9 }
 0x401   :  { %1341 = vmatpush3.bf16.msra.mxu0 %v752_v62  ;;  %v754_v2 = vpack.c.bf16 %v727_v7, %v726_v8 }
 0x402   :  { %v753_v1 = vpack.c.bf16 %v725_v17, %v724_v23  ;;  %p1499_p13 = por %p1498_p12, %p1497_p11 }
 0x404   :  { %1342 = vmatprep.subr.bf16.mxu0 %v753_v1  ;;  %p1500_p0 = pnand %p1499_p13, %p1493_p10 }
 0x405   :  { %1343 = vmatpush3.bf16.msra.mxu0 %v753_v1 }
 0x406   :  { %1344 = vmatprep.subr.bf16.mxu0 %v754_v2 }
 0x409   :  { %1345 = vmatpush3.bf16.msra.mxu0 %v754_v2 }
 0x40c   :  { %1347 = vmatmul.mubr.bf16.vlgmr.msra.gmra.mrb[32].mxu0 %v1653_v37 }
 0x40d   :  { %1350 = vmatprep.mubr.bf16.mxu0 %v1655_v39 }
 0x414   :  { %1351 = vmatmul.mubr.bf16.gmra.mrb[36].mxu0 %v1659_v44 }
 0x415   :  { %1354 = vmatprep.mubr.bf16.mxu0 %v1661_v45 }
 0x41c   :  { %1355 = vmatmul.mubr.bf16.gmra.mrb[40].mxu0 %v1665_v50 }
 0x41d   :  { %1358 = vmatprep.mubr.bf16.mxu0 %v1667_v51 }
 0x424   :  { %1359 = vmatmul.mubr.bf16.gmra.mrb[44].mxu0 %v1671_v54 }
 0x4df   :  { %v1348_v9 = vpop.f32.mrb[32].mxu0 }
 0x4e0   :  { %v789_v14 = vpop.f32.mrb[33].mxu0 }
 0x4e1   :  { %v1349_v32 = vpop.f32.mrb[34].mxu0 }
 0x4e2   :  { %v853_v18 = vpack.c.bf16 %v1349_v32, %v1348_v9  ;;  %v792_v37 = vpop.f32.mrb[35].mxu0 }
 0x4e3   :  { %v852_v19 = vpack.c.bf16 %v792_v37, %v789_v14 }
 0x4e5   :  { %1378 = vmatprep.mubr.bf16.mxu1 %v852_v19 }
 0x4e6   :  { %1379 = vmatmul.mubr.bf16.vlgmr.msra.gmra.mrb[32].mxu1 %v853_v18 }
 0x4e7   :  { %v1352_v39 = vpop.f32.mrb[36].mxu0 }
 0x4e8   :  { %v805_v44 = vpop.f32.mrb[37].mxu0 }
 0x4e9   :  { %v1353_v45 = vpop.f32.mrb[38].mxu0 }
 0x4ea   :  { %v855_v12 = vpack.c.bf16 %v1353_v45, %v1352_v39  ;;  %v808_v50 = vpop.f32.mrb[39].mxu0 }
 0x4eb   :  { %v854_v33 = vpack.c.bf16 %v808_v50, %v805_v44 }
 0x4ed   :  { %1382 = vmatprep.mubr.bf16.mxu1 %v854_v33 }
 0x4ee   :  { %1383 = vmatmul.mubr.bf16.gmra.mrb[36].mxu1 %v855_v12 }
 0x4ef   :  { %v1356_v51 = vpop.f32.mrb[40].mxu0 }
 0x4f0   :  { %v821_v54 = vpop.f32.mrb[41].mxu0 }
 0x4f1   :  { %v1357_v22 = vpop.f32.mrb[42].mxu0 }
 0x4f2   :  { %v857_v26 = vpack.c.bf16 %v1357_v22, %v1356_v51  ;;  %v824_v34 = vpop.f32.mrb[43].mxu0 }
 0x4f3   :  { %v856_v38 = vpack.c.bf16 %v824_v34, %v821_v54 }
 0x4f5   :  { %1386 = vmatprep.mubr.bf16.mxu1 %v856_v38 }
 0x4f6   :  { %1387 = vmatmul.mubr.bf16.gmra.mrb[40].mxu1 %v857_v26 }
 0x4f7   :  { %v1360_v48 = vpop.f32.mrb[44].mxu0 }
 0x4f8   :  { %v837_v4 = vpop.f32.mrb[45].mxu0 }
 0x4f9   :  { %v1361_v40 = vpop.f32.mrb[46].mxu0 }
 0x4fa   :  { %v859_v41 = vpack.c.bf16 %v1361_v40, %v1360_v48  ;;  %v840_v21 = vpop.f32.mrb[47].mxu0 }
 0x4fb   :  { %v858_v61 = vpack.c.bf16 %v840_v21, %v837_v4 }
 0x4fd   :  { %1390 = vmatprep.mubr.bf16.mxu1 %v858_v61 }
 0x4fe   :  { %1391 = vmatmul.mubr.bf16.gmra.mrb[44].mxu1 %v859_v41 }
 0x5b9   :  { %v1380_v47 = vpop.f32.mrb[32].mxu1 }
 0x5ba   :  { %v957_v58 = vadd.f32 %v1380_v47, %v1943_v43  ;;  %v948_v59 = vpop.f32.mrb[33].mxu1 }
 0x5bb   :  { %v949_v62 = vadd.f32 %v1943_v43, %v948_v59  ;;  %v1381_v1 = vpop.f32.mrb[34].mxu1 }
 0x5bc   :  { %v1013_v2 = vadd.f32 %v957_v58, %v714_v57  ;;  %v960_v42 = vadd.f32 %v1381_v1, %v1943_v43  ;;  %v951_v9 = vpop.f32.mrb[35].mxu1 }
 0x5bd   :  { %v1011_v14 = vadd.f32 %v949_v62, %v712_v63  ;;  %v952_v32 = vadd.f32 %v1943_v43, %v951_v9 }
 0x5be   :  { %v1029_v18 = vmax.f32 %v1013_v2, 0.0  ;;  %v1014_v37 = vadd.f32 %v960_v42, %v715_v55 }
 0x5bf   :  { %v1027_v19 = vmax.f32 %v1011_v14, 0.0  ;;  %v1012_v39 = vadd.f32 %v952_v32, %v713_v60 }
 0x5c0   :  { %1045 = vst [vmem:[#allocation8 + $0x10] sm:$0xff] %v1029_v18  ;;  %v1030_v44 = vmax.f32 %v1014_v37, 0.0 }
 0x5c1   :  { %1043 = vst [vmem:[#allocation8] sm:$0xff] %v1027_v19  ;;  %v1028_v16 = vmax.f32 %v1012_v39, 0.0  ;;  %v1384_v57 = vpop.f32.mrb[36].mxu1 }
 0x5c2   :  { %1046 = vst [vmem:[#allocation8 + $0x18] sm:$0xff] %v1030_v44  ;;  %v973_v45 = vadd.f32 %v1384_v57, %v1943_v43  ;;  %v964_v52 = vpop.f32.mrb[37].mxu1 }
 0x5c3   :  { %1044 = vst [vmem:[#allocation8 + $0x8] sm:$0xff] %v1028_v16  ;;  %v965_v63 = vadd.f32 %v1943_v43, %v964_v52  ;;  %v1385_v12 = vpop.f32.mrb[38].mxu1 }
 0x5c4   :  { %v1017_v53 = vadd.f32 %v973_v45, %v718_v25  ;;  %v976_v55 = vadd.f32 %v1385_v12, %v1943_v43  ;;  %v967_v56 = vpop.f32.mrb[39].mxu1 }
 0x5c5   :  { %v1015_v60 = vadd.f32 %v965_v63, %v716_v6  ;;  %v968_v50 = vadd.f32 %v1943_v43, %v967_v56 }
 0x5c6   :  { %v1033_v33 = vmax.f32 %v1017_v53, 0.0  ;;  %v1018_v51 = vadd.f32 %v976_v55, %v719_v31 }
 0x5c7   :  { %v1031_v54 = vmax.f32 %v1015_v60, 0.0  ;;  %v1016_v22 = vadd.f32 %v968_v50, %v717_v11 }
 0x5c8   :  { %1049 = vst [vmem:[#allocation8 + $0x30] sm:$0xff] %v1033_v33  ;;  %v1034_v26 = vmax.f32 %v1018_v51, 0.0 }
 0x5c9   :  { %1047 = vst [vmem:[#allocation8 + $0x20] sm:$0xff] %v1031_v54  ;;  %v1032_v30 = vmax.f32 %v1016_v22, 0.0  ;;  %v1388_v25 = vpop.f32.mrb[40].mxu1 }
 0x5ca   :  { %1050 = vst [vmem:[#allocation8 + $0x38] sm:$0xff] %v1034_v26  ;;  %v989_v34 = vadd.f32 %v1388_v25, %v1943_v43  ;;  %v980_v24 = vpop.f32.mrb[41].mxu1 }
 0x5cb   :  { %1048 = vst [vmem:[#allocation8 + $0x28] sm:$0xff] %v1032_v30  ;;  %v981_v6 = vadd.f32 %v1943_v43, %v980_v24  ;;  %v1389_v38 = vpop.f32.mrb[42].mxu1 }
 0x5cc   :  { %v1021_v29 = vadd.f32 %v989_v34, %v722_v46  ;;  %v992_v31 = vadd.f32 %v1389_v38, %v1943_v43  ;;  %v983_v10 = vpop.f32.mrb[43].mxu1 }
 0x5cd   :  { %v1019_v11 = vadd.f32 %v981_v6, %v720_v15  ;;  %v984_v48 = vadd.f32 %v1943_v43, %v983_v10 }
 0x5ce   :  { %v1037_v4 = vmax.f32 %v1021_v29, 0.0  ;;  %v1022_v40 = vadd.f32 %v992_v31, %v723_v20 }
 0x5cf   :  { %v1035_v41 = vmax.f32 %v1019_v11, 0.0  ;;  %v1020_v21 = vadd.f32 %v984_v48, %v721_v5 }
 0x5d0   :  { %1053 = vst [vmem:[#allocation8 + $0x50] sm:$0xff] %v1037_v4  ;;  %v1038_v61 = vmax.f32 %v1022_v40, 0.0 }
 0x5d1   :  { %1051 = vst [vmem:[#allocation8 + $0x40] sm:$0xff] %v1035_v41  ;;  %v1036_v49 = vmax.f32 %v1020_v21, 0.0  ;;  %v1392_v46 = vpop.f32.mrb[44].mxu1 }
 0x5d2   :  { %1054 = vst [vmem:[#allocation8 + $0x58] sm:$0xff] %v1038_v61  ;;  %v1005_v47 = vadd.f32 %v1392_v46, %v1943_v43  ;;  %v996_v36 = vpop.f32.mrb[45].mxu1 }
 0x5d3   :  { %1052 = vst [vmem:[#allocation8 + $0x48] sm:$0xff] %v1036_v49  ;;  %v997_v15 = vadd.f32 %v1943_v43, %v996_v36  ;;  %v1393_v58 = vpop.f32.mrb[46].mxu1 }
 0x5d4   :  { %v1025_v13 = vadd.f32 %v1005_v47, %v726_v8  ;;  %v1008_v20 = vadd.f32 %v1393_v58, %v1943_v43  ;;  %v999_v35 = vpop.f32.mrb[47].mxu1 }
 0x5d5   :  { %v1023_v5 = vadd.f32 %v997_v15, %v724_v23  ;;  %v1000_v59 = vadd.f32 %v1943_v43, %v999_v35 }
 0x5d6   :  { %v1041_v62 = vmax.f32 %v1025_v13, 0.0  ;;  %v1026_v1 = vadd.f32 %v1008_v20, %v727_v7 }
 0x5d7   :  { %v1039_v2 = vmax.f32 %v1023_v5, 0.0  ;;  %v1024_v42 = vadd.f32 %v1000_v59, %v725_v17 }
 0x5d8   :  { %1057 = vst [vmem:[#allocation8 + $0x70] sm:$0xff] %v1041_v62  ;;  %v1042_v27 = vmax.f32 %v1026_v1, 0.0 }
 0x5d9   :  { %1055 = vst [vmem:[#allocation8 + $0x60] sm:$0xff] %v1039_v2  ;;  %v1040_v8 = vmax.f32 %v1024_v42, 0.0 }
 0x5da   :  { %1058 = vst [vmem:[#allocation8 + $0x78] sm:$0xff] %v1042_v27 }
 0x5db   :  { %1056 = vst [vmem:[#allocation8 + $0x68] sm:$0xff] %v1040_v8 }
 0x5dc   :  { %1503 = shalt.err (!%p1500_p0)
}
 0x5dd   :  { %s1504_s12 = scalar_lea.hbm %s2012_s4, 2048 }
 0x5de   :  { %p1505_p1 = scmp.ne.s32.totalorder %s2012_s4, %s1504_s12  ;;  %p1508_p2 = scmp.lt.u32.totalorder %s1504_s12, %s2012_s4 }
 0x5e0   :  { %p1510_p3 = pnand %p1508_p2, %p1505_p1 }
 0x5e2   :  { %1513 = shalt.err (!%p1510_p3)
}
 0x5e3   :  { %1070 = dma.vmem_to_hbm [thread:$0]  %s1065_s8, 2048, %s2012_s4, [#allocation4], %s1522_s27, %s1522_s27, %s1523_s28  }
 0x5e4   :  { %1518 = dma.done.wait [#allocation4], 2048  }
 0x5e5   :  { %1519 = vsyncadd [#allocation4], 4294965248 }
 0x5e6   :  { %1074 = vsyncpa [#allocation3], 1 }
 0x5e7   :  { %1075 = vsyncpa [#allocation6], 1 }
 0x5e8   :  { %1076 = vsyncpa [#allocation4], 1 }

</bundles_post_ra>
